<compile_context>
chip_gen: v5e
topology: v5e:2x2
jax: 0.10.0
libtpu: 0.0.40
codegen_flags: <defaults>
</compile_context>

<pallas_src>
import jax
import jax.numpy as jnp
from jax.experimental import pallas as pl
from jax.experimental.pallas import tpu as pltpu


def _round_up(n: int, m: int) -> int:
    return ((n + m - 1) // m) * m


def _cdiv(a: int, b: int) -> int:
    return -(-a // b)


def encoder_kernel(x_ref, w1_ref, b1_ref, wp_ref, bp_ref, out_ref):
    # fc1: MXU matmul with f32 accumulation; bias-add + ReLU in f32 (VPU).
    h = jnp.dot(x_ref[...], w1_ref[...], preferred_element_type=jnp.float32)
    h = jnp.maximum(h + b1_ref[...], 0.0)
    # Cast back to the compute dtype right away: halves the live intermediate
    # between the two MXU passes (avoids vreg spills at scaled hidden dims).
    h = h.astype(wp_ref.dtype)
    # Fused [mu | logvar] head: one matmul + one store instead of two.
    out = jnp.dot(h, wp_ref[...], preferred_element_type=jnp.float32)
    out_ref[...] = (out + bp_ref[...]).astype(out_ref.dtype)


def pack_encoder_params(params, compute_dtype=jnp.bfloat16):
    """ONE-TIME packing (do not call per forward): fuse [Wmu | Wlv] into a
    single projection and cast matmul operands to the compute dtype.
    Biases stay f32 because the kernel epilogue is f32."""
    wp = jnp.concatenate([params["wmu"], params["wlv"]], axis=1)
    bp = jnp.concatenate([params["bmu"], params["blv"]], axis=1)
    return {
        "w1": params["w1"].astype(compute_dtype),
        "b1": params["b1"].astype(jnp.float32).reshape(1, -1),
        "wp": wp.astype(compute_dtype),
        "bp": bp.astype(jnp.float32).reshape(1, -1),
    }


def _choose_tb(B: int, block_b: int) -> int:
    # >= 2 batch tiles whenever B allows (lets v7x shard across its 2 TCs),
    # 16-row granularity (sublane multiple, bf16-packing friendly), then
    # shrink the tile so batch-pad waste stays small.
    tb = min(block_b, _round_up(max(_cdiv(B, 2), 8), 16))
    n_tiles = _cdiv(B, tb)
    return _round_up(_cdiv(B, n_tiles), 16)


def encoder_forward(x, packed, *, block_b=512, out_dtype=jnp.float32):
    """x: (B, input_dim) float. packed: output of pack_encoder_params.
    Returns (mu, logvar), each (B, latent_dim) in out_dtype."""
    B, input_dim = x.shape
    w1, b1, wp, bp = packed["w1"], packed["b1"], packed["wp"], packed["bp"]
    assert w1.shape[0] == input_dim
    hidden_dim = w1.shape[1]
    out_w = wp.shape[1]                 # 2 * latent_dim (packed head)
    latent_dim = out_w // 2
    compute_dtype = w1.dtype

    # x stays at its native lane width (full-dim block exception); only the
    # batch is padded, and only when needed.
    tb = _choose_tb(B, block_b)
    b_pad = _round_up(B, tb)
    x_in = x.astype(compute_dtype)
    if b_pad != B:
        x_in = jnp.pad(x_in, ((0, b_pad - B), (0, 0)))

    grid = (b_pad // tb,)

    esize = jnp.dtype(compute_dtype).itemsize
    osize = jnp.dtype(out_dtype).itemsize
    w_bytes = (input_dim * hidden_dim + hidden_dim * out_w) * esize
    b_bytes = (hidden_dim + out_w) * 4
    flops = 2 * b_pad * (input_dim * hidden_dim + hidden_dim * out_w)
    bytes_accessed = b_pad * input_dim * esize + w_bytes + b_bytes + b_pad * out_w * osize

    # Double-buffered x/out tiles + resident weights + live h, with headroom.
    # Set explicitly so v5e's 16 MiB scoped default never bites at scale; on
    # v7x remember weights are duplicated per TensorCore within 64 MiB phys.
    vmem_need = (2 * tb * input_dim * esize + 2 * tb * out_w * osize
                 + w_bytes + b_bytes + tb * hidden_dim * 4)
    vmem_limit = int(min(max(2 * vmem_need, 8 << 20), 100 << 20))

    out = pl.pallas_call(
        encoder_kernel,
        out_shape=jax.ShapeDtypeStruct((b_pad, out_w), out_dtype),
        grid=grid,
        in_specs=[
            # x streamed along batch; last dim = full array dim (no lane pad).
            # If profiling shows the x DMA exposed, add
            # pipeline_mode=pl.Buffered(3) to this spec only.
            pl.BlockSpec((tb, input_dim), lambda i: (i, 0)),
            # Weights / biases: constant index_map -> fetched once, resident.
            pl.BlockSpec((input_dim, hidden_dim), lambda i: (0, 0)),
            pl.BlockSpec((1, hidden_dim), lambda i: (0, 0)),
            pl.BlockSpec((hidden_dim, out_w), lambda i: (0, 0)),
            pl.BlockSpec((1, out_w), lambda i: (0, 0)),
        ],
        # Output last dim = 2*latent (full-dim exception): ~4x less writeback
        # than a 128-lane-padded slab when latent is small.
        out_specs=pl.BlockSpec((tb, out_w), lambda i: (i, 0)),
        cost_estimate=pl.CostEstimate(flops=flops, transcendentals=0,
                                      bytes_accessed=bytes_accessed),
        compiler_params=pltpu.CompilerParams(
            dimension_semantics=("parallel",),   # batch tiles are independent
            vmem_limit_bytes=vmem_limit,
        ),
    )(x_in, w1, b1, wp, bp)

    # Consumers that can take the packed [mu | logvar] slab directly should
    # skip this split; for the reference Encoder API we split here.
    mu = out[:B, :latent_dim]
    logvar = out[:B, latent_dim:]
    return mu, logvar


def init_params(key, input_dim, hidden_dim, latent_dim):
    """Deterministic synthetic params. Stored as (in, out) = transpose of nn.Linear."""
    k1, k2, k3, k4, k5, k6 = jax.random.split(key, 6)
    s1 = 1.0 / jnp.sqrt(input_dim)
    s2 = 1.0 / jnp.sqrt(hidden_dim)
    return {
        "w1": jax.random.uniform(k1, (input_dim, hidden_dim), jnp.float32, -s1, s1),
        "b1": jax.random.uniform(k2, (1, hidden_dim), jnp.float32, -s1, s1),
        "wmu": jax.random.uniform(k3, (hidden_dim, latent_dim), jnp.float32, -s2, s2),
        "bmu": jax.random.uniform(k4, (1, latent_dim), jnp.float32, -s2, s2),
        "wlv": jax.random.uniform(k5, (hidden_dim, latent_dim), jnp.float32, -s2, s2),
        "blv": jax.random.uniform(k6, (1, latent_dim), jnp.float32, -s2, s2),
    }


def encoder_ref(x, p):
    h = jnp.maximum(x @ p["w1"] + p["b1"], 0.0)
    return h @ p["wmu"] + p["bmu"], h @ p["wlv"] + p["blv"]


if __name__ == "__main__":
    batch, input_dim, hidden_dim, latent_dim = 8, 32, 32, 16

    key = jax.random.PRNGKey(0)
    kx, kp = jax.random.split(key)
    x = jax.random.normal(kx, (batch, input_dim), jnp.float32)
    params = init_params(kp, input_dim, hidden_dim, latent_dim)
    mu_ref, logvar_ref = encoder_ref(x, params)

    # One-time packing: exact f32 path and the default bf16 (MXU-native) path.
    packed_f32 = pack_encoder_params(params, jnp.float32)
    packed_bf16 = pack_encoder_params(params, jnp.bfloat16)

    # 1) f32 compute path, tight check.
    mu, logvar = encoder_forward(x, packed_f32)
    jax.block_until_ready((mu, logvar))
    assert mu.shape == (batch, latent_dim) and logvar.shape == (batch, latent_dim)
    assert jnp.allclose(mu, mu_ref, atol=1e-5), "mu mismatch (f32)"
    assert jnp.allclose(logvar, logvar_ref, atol=1e-5), "logvar mismatch (f32)"

    # 2) bf16 MXU path (default for v5e/v6e/v7x), f32 accumulation/epilogue.
    mu_b, logvar_b = encoder_forward(x, packed_bf16)
    jax.block_until_ready((mu_b, logvar_b))
    assert jnp.allclose(mu_b, mu_ref, atol=7e-2), "mu mismatch (bf16)"
    assert jnp.allclose(logvar_b, logvar_ref, atol=7e-2), "logvar mismatch (bf16)"

    # 3) Larger, non-aligned batch: multi-tile grid + batch-pad path.
    batch2 = 300
    x2 = jax.random.normal(jax.random.PRNGKey(1), (batch2, input_dim), jnp.float32)
    mu2, logvar2 = encoder_forward(x2, packed_f32, block_b=128)
    jax.block_until_ready((mu2, logvar2))
    mu2_ref, logvar2_ref = encoder_ref(x2, params)
    assert mu2.shape == (batch2, latent_dim)
    assert jnp.allclose(mu2, mu2_ref, atol=1e-5), "mu mismatch (tiled)"
    assert jnp.allclose(logvar2, logvar2_ref, atol=1e-5), "logvar mismatch (tiled)"

    print("KERNEL_OK")
</pallas_src>

<mosaic_0001>
module attributes {stable_mosaic.version = 11 : i64} {
  func.func @encoder_kernel(%arg0: i32, %arg1: memref<16x32xf32, #tpu.memory_space<vmem>>, %arg2: memref<32x32xf32, #tpu.memory_space<vmem>>, %arg3: memref<1x32xf32, #tpu.memory_space<vmem>>, %arg4: memref<32x32xf32, #tpu.memory_space<vmem>>, %arg5: memref<1x32xf32, #tpu.memory_space<vmem>>, %arg6: memref<16x32xf32, #tpu.memory_space<vmem>>) attributes {dimension_semantics = [#tpu.dimension_semantics<parallel>], iteration_bounds = array<i64: 1>, scalar_prefetch = 0 : i64, scratch_operands = 0 : i64, tpu.core_type = #tpu.core_type<tc>, window_params = [{transform_indices = @transform_0, window_bounds = array<i64: 16, 32>}, {pipeline_mode = #tpu.pipeline_mode<synchronous>, transform_indices = @transform_1, window_bounds = array<i64: 32, 32>}, {pipeline_mode = #tpu.pipeline_mode<synchronous>, transform_indices = @transform_2, window_bounds = array<i64: 1, 32>}, {pipeline_mode = #tpu.pipeline_mode<synchronous>, transform_indices = @transform_3, window_bounds = array<i64: 32, 32>}, {pipeline_mode = #tpu.pipeline_mode<synchronous>, transform_indices = @transform_4, window_bounds = array<i64: 1, 32>}, {transform_indices = @transform_5, window_bounds = array<i64: 16, 32>}]} {
    %c0 = arith.constant 0 : index
    %c0_0 = arith.constant 0 : index
    %0 = vector.load %arg1[%c0, %c0_0] : memref<16x32xf32, #tpu.memory_space<vmem>>, vector<16x32xf32>
    %c0_1 = arith.constant 0 : index
    %c0_2 = arith.constant 0 : index
    %1 = vector.load %arg2[%c0_1, %c0_2] : memref<32x32xf32, #tpu.memory_space<vmem>>, vector<32x32xf32>
    %cst = arith.constant dense<0.000000e+00> : vector<16x32xf32>
    %2 = tpu.matmul %0, %1, %cst {dimension_numbers = #tpu.dot_dimension_numbers<[1], [0], [0], [1], [0, 0, 1, 1], [], []>} : vector<16x32xf32>, vector<32x32xf32>, vector<16x32xf32> -> vector<16x32xf32>
    %c0_3 = arith.constant 0 : index
    %c0_4 = arith.constant 0 : index
    %3 = vector.load %arg3[%c0_3, %c0_4] : memref<1x32xf32, #tpu.memory_space<vmem>>, vector<1x32xf32>
    %4 = vector.broadcast %3 : vector<1x32xf32> to vector<16x32xf32>
    %5 = arith.addf %2, %4 : vector<16x32xf32>
    %cst_5 = arith.constant 0.000000e+00 : f32
    %6 = vector.broadcast %cst_5 : f32 to vector<16x32xf32>
    %7 = arith.maximumf %5, %6 : vector<16x32xf32>
    %c0_6 = arith.constant 0 : index
    %c0_7 = arith.constant 0 : index
    %8 = vector.load %arg4[%c0_6, %c0_7] : memref<32x32xf32, #tpu.memory_space<vmem>>, vector<32x32xf32>
    %cst_8 = arith.constant dense<0.000000e+00> : vector<16x32xf32>
    %9 = tpu.matmul %7, %8, %cst_8 {dimension_numbers = #tpu.dot_dimension_numbers<[1], [0], [0], [1], [0, 0, 1, 1], [], []>} : vector<16x32xf32>, vector<32x32xf32>, vector<16x32xf32> -> vector<16x32xf32>
    %c0_9 = arith.constant 0 : index
    %c0_10 = arith.constant 0 : index
    %10 = vector.load %arg5[%c0_9, %c0_10] : memref<1x32xf32, #tpu.memory_space<vmem>>, vector<1x32xf32>
    %11 = vector.broadcast %10 : vector<1x32xf32> to vector<16x32xf32>
    %12 = arith.addf %9, %11 : vector<16x32xf32>
    %c0_11 = arith.constant 0 : index
    %c0_12 = arith.constant 0 : index
    %13 = vector.load %arg6[%c0_11, %c0_12] : memref<16x32xf32, #tpu.memory_space<vmem>>, vector<16x32xf32>
    tpu.vector_store %arg6[%c0_11, %c0_12], %12 {strides = array<i32>} : memref<16x32xf32, #tpu.memory_space<vmem>>, vector<16x32xf32>,
    return
  }
  func.func @transform_0(%arg0: i32) -> (i32, i32) {
    %c0_i32 = arith.constant 0 : i32
    %c0_i32_0 = arith.constant 0 : i32
    return %arg0, %c0_i32 : i32, i32
  }
  func.func @transform_1(%arg0: i32) -> (i32, i32) {
    %c0_i32 = arith.constant 0 : i32
    %c0_i32_0 = arith.constant 0 : i32
    %c0_i32_1 = arith.constant 0 : i32
    return %c0_i32, %c0_i32_0 : i32, i32
  }
  func.func @transform_2(%arg0: i32) -> (i32, i32) {
    %c0_i32 = arith.constant 0 : i32
    %c0_i32_0 = arith.constant 0 : i32
    %c0_i32_1 = arith.constant 0 : i32
    return %c0_i32, %c0_i32_0 : i32, i32
  }
  func.func @transform_3(%arg0: i32) -> (i32, i32) {
    %c0_i32 = arith.constant 0 : i32
    %c0_i32_0 = arith.constant 0 : i32
    %c0_i32_1 = arith.constant 0 : i32
    return %c0_i32, %c0_i32_0 : i32, i32
  }
  func.func @transform_4(%arg0: i32) -> (i32, i32) {
    %c0_i32 = arith.constant 0 : i32
    %c0_i32_0 = arith.constant 0 : i32
    %c0_i32_1 = arith.constant 0 : i32
    return %c0_i32, %c0_i32_0 : i32, i32
  }
  func.func @transform_5(%arg0: i32) -> (i32, i32) {
    %c0_i32 = arith.constant 0 : i32
    %c0_i32_0 = arith.constant 0 : i32
    return %arg0, %c0_i32 : i32, i32
  }
}

</mosaic_0001>

<bundles_post_ra>
// kernel: tpu_custom_call.1
= control target key start
LH: loop header
LB: loop body
LE: loop exit
PB: predicated region body
PF: predicated region fallthrough
CT: control target
= control target key end

     0   :  { %10 = vsyncpa [#allocation3], 0  ;;  %s363_s0 = inlined_call_operand.hbm [shape: f32[16,32], index: 0, kind: input, shape index: {}]   ;;  %s364_s1 = inlined_call_operand.hbm [shape: f32[32,32], index: 1, kind: input, shape index: {}]   ;;  %s365_s2 = inlined_call_operand.vmem [shape: f32[1,32], index: 2, kind: input, shape index: {}]   ;;  %s366_s3 = inlined_call_operand.hbm [shape: f32[32,32], index: 3, kind: input, shape index: {}]   ;;  %s367_s4 = inlined_call_operand.vmem [shape: f32[1,32], index: 4, kind: input, shape index: {}]   ;;  %s368_s5 = inlined_call_operand.hbm [shape: f32[16,32], index: 5, kind: output, shape index: {}]  }
   0x1   :  { %11 = vsyncpa [#allocation6], 0 }
   0x2   :  { %12 = vsyncpa [#allocation4], 0  ;;  %s30_s20 = sshll.u32 %s364_s1, 4  ;;  %s291_s21 = smov [#allocation5]   ;;  %s31_s20 = int_to_ptr.hbm [resolvable:$true] %s30_s20 }
   0x3   :  { %s32_s22 = sshll.u32 %s291_s21, 4  ;;  %s17_s25 = sshll.u32 %s363_s0, 4  ;;  %s33_s22 = int_to_ptr.vmem [resolvable:$true] %s32_s22  ;;  %s18_s25 = int_to_ptr.hbm [resolvable:$true] %s17_s25 }
   0x4   :  { %s292_s26 = smov 128   ;;  %s293_s27 = smov 8  }
   0x5   :  { %38 = dma.hbm_to_vmem [thread:$0]  %s31_s20, 512, %s33_s22, [#allocation6], %s292_s26, %s292_s26, %s293_s27  }
   0x6   :  { %s294_s28 = smov [#allocation2]   ;;  %s45_s1 = sshll.u32 %s366_s3, 4  ;;  %s46_s1 = int_to_ptr.hbm [resolvable:$true] %s45_s1 }
   0x7   :  { %s19_s29 = sshll.u32 %s294_s28, 4  ;;  %s295_s0 = smov [#allocation7]   ;;  %s20_s29 = int_to_ptr.vmem [resolvable:$true] %s19_s29 }
   0x8   :  { %25 = dma.hbm_to_vmem [thread:$0]  %s18_s25, 256, %s20_s29, [#allocation3], %s292_s26, %s292_s26, %s293_s27  }
   0x9   :  { %s47_s7 = sshll.u32 %s295_s0, 4  ;;  %s48_s7 = int_to_ptr.vmem [resolvable:$true] %s47_s7 }
   0xa   :  { %53 = dma.hbm_to_vmem [thread:$0]  %s46_s1, 512, %s48_s7, [#allocation6], %s292_s26, %s292_s26, %s293_s27  }
   0xb   :  { %285 = dma.done.wait [#allocation3], 256  }
   0xc   :  { %286 = vsyncadd [#allocation3], 4294967040 }
   0xd   :  { %287 = dma.done.wait [#allocation6], 1024  }
   0xe   :  { %288 = vsyncadd [#allocation6], 4294966272  ;;  %v73_v0 = vld [vmem:[#allocation5 + $0x18] sm:$0xff]  ;;  %v72_v1 = vld [vmem:[#allocation5 + $0x10] sm:$0xff]  ;;  %vm78_vm0 = vcmask 261120   ;;  %s296_s11 = smov [#allocation8]  }
   0xf   :  { %173 = vmatpush.msra.mxu2 %v73_v0  ;;  %97 = vmatpush.msra.mxu0 %v73_v0  ;;  %v71_v2 = vld [vmem:[#allocation5 + $0x8] sm:$0xff]  ;;  %v113_v3 = vld [vmem:[#allocation7 + $0x18] sm:$0xff]  ;;  %v70_v4 = vld [vmem:[#allocation5] sm:$0xff]  ;;  %s155_s14 = sshll.u32 %s368_s5, 4  ;;  %s156_s14 = int_to_ptr.hbm [resolvable:$true] %s155_s14 }
  0x10   :  { %177 = vmatpush.msra.mxu3 %v113_v3  ;;  %136 = vmatpush.msra.mxu1 %v113_v3  ;;  %v69_v5 = vld [vmem:[#allocation2 + $0x8] sm:$0xff]  ;;  %v68_v6 = vld [vmem:[#allocation2] sm:$0xff]  ;;  %v111_v8 = vld [vmem:[#allocation7 + $0x8] sm:$0xff] }
  0x11   :  { %174 = vmatpush.msra.mxu2 %v72_v1  ;;  %98 = vmatpush.msra.mxu0 %v72_v1  ;;  %v112_v7 = vld [vmem:[#allocation7 + $0x10] sm:$0xff]  ;;  %v110_v9 = vld [vmem:[#allocation7] sm:$0xff] }
  0x12   :  { %178 = vmatpush.msra.mxu3 %v112_v7  ;;  %137 = vmatpush.msra.mxu1 %v112_v7  ;;  %v187_v10 = vld [vmem:[%s365_s2] ss:$0 sm:$0xff]  ;;  %s153_s2 = sshll.u32 %s296_s11, 4  ;;  %s154_s2 = int_to_ptr.vmem [resolvable:$true] %s153_s2 }
  0x13   :  { %175 = vmatpush.msra.mxu2 %v71_v2  ;;  %99 = vmatpush.msra.mxu0 %v71_v2  ;;  %v188_v17 = vld [vmem:[%s367_s4] ss:$0 sm:$0xff] }
  0x14   :  { %179 = vmatpush.msra.mxu3 %v111_v8  ;;  %138 = vmatpush.msra.mxu1 %v111_v8 }
  0x15   :  { %176 = vmatpush.msra.mxu2 %v70_v4  ;;  %100 = vmatpush.msra.mxu0 %v70_v4 }
  0x16   :  { %170 = vmatmul.msk.f32.vlgmr.msra.gmra.mxu2 %vm78_vm0, %v69_v5  ;;  %169 = vmatmul.msk.f32.vlgmr.msra.gmra.mxu0 %vm78_vm0, %v68_v6 }
  0x17   :  { %180 = vmatpush.msra.mxu3 %v110_v9  ;;  %139 = vmatpush.msra.mxu1 %v110_v9 }
  0x93   :  { %v102_v11 = vpop.f32.mrf.mxu0 }
  0x94   :  { %v103_v12 = vadd.f32 %v187_v10, %v102_v11 }
  0x96   :  { %v108_v13 = vmax.f32 %v103_v12, 0.0 }
  0x98   :  { %171 = vmatmul.msk.f32.vlgmr.msra.gmra.mxu1 %vm78_vm0, %v108_v13 }
  0x99   :  { %v105_v14 = vpop.f32.mrf.mxu2 }
  0x9a   :  { %v106_v15 = vadd.f32 %v187_v10, %v105_v14 }
  0x9c   :  { %v109_v16 = vmax.f32 %v106_v15, 0.0 }
  0x9e   :  { %172 = vmatmul.msk.f32.vlgmr.msra.gmra.mxu3 %vm78_vm0, %v109_v16 }
 0x115   :  { %v141_v18 = vpop.f32.mrf.mxu1 }
 0x116   :  { %v142_v19 = vadd.f32 %v188_v17, %v141_v18 }
 0x118   :  { %147 = vst.msk [vmem:[#allocation8] sm:$0xff] %vm78_vm0, %v142_v19 }
 0x121   :  { %v144_v20 = vpop.f32.mrf.mxu3 }
 0x122   :  { %v145_v21 = vadd.f32 %v188_v17, %v144_v20 }
 0x124   :  { %148 = vst.msk [vmem:[#allocation8 + $0x8] sm:$0xff] %vm78_vm0, %v145_v21 }
 0x125   :  { %161 = dma.vmem_to_hbm [thread:$0]  %s154_s2, 256, %s156_s14, [#allocation4], %s292_s26, %s292_s26, %s293_s27  }
 0x126   :  { %289 = dma.done.wait [#allocation4], 256  }
 0x127   :  { %290 = vsyncadd [#allocation4], 4294967040 }
 0x128   :  { %166 = vsyncpa [#allocation3], 1 }
 0x129   :  { %167 = vsyncpa [#allocation6], 1 }
 0x12a   :  { %168 = vsyncpa [#allocation4], 1 }

</bundles_post_ra>
